<compile_context>
chip_gen: v6e
topology: v6e:2x2x1
jax: 0.10.0
libtpu: 0.0.40
codegen_flags: <defaults>
</compile_context>

<pallas_src>
import functools
import math

import jax
import jax.numpy as jnp
from jax.experimental import pallas as pl
from jax.experimental.pallas import tpu as pltpu


def _lora_linear_kernel(x_ref, w_ref, xa_ref, b_ref, bias_ref, o_ref, *scratch,
                        accumulate_in_output):
    """grid = (M//tm, N//tn, K//tk); K is the innermost reduction axis."""
    acc_ref = o_ref if accumulate_in_output else scratch[0]
    k = pl.program_id(2)

    @pl.when(k == 0)
    def _():
        acc_ref[...] = jnp.zeros_like(acc_ref)

    # Main path partial product on the MXU: (tm, tk) @ (tk, tn), f32 accumulate.
    acc_ref[...] += jnp.dot(x_ref[...], w_ref[...],
                            preferred_element_type=jnp.float32)

    @pl.when(k == pl.num_programs(2) - 1)
    def _():
        # LoRA up-projection: (tm, r) @ (r, tn).  alpha is pre-folded into B.
        lora = jnp.dot(xa_ref[...], b_ref[...],
                       preferred_element_type=jnp.float32)
        out = acc_ref[...] + bias_ref[...].astype(jnp.float32) + lora
        # TODO(synk): training-mode nn.Dropout on the LoRA branch is not
        # implemented (eval mode => identity).
        o_ref[...] = out.astype(o_ref.dtype)


def _round_up(x, m):
    return ((x + m - 1) // m) * m


def _tile_for(dim, target, align):
    """Aligned tile size: cap at `target`, but never below the aligned dim."""
    return min(target, _round_up(dim, align))


def lora_linear_pallas(x, w_t, bias, A, B, alpha, *,
                       tm=512, tn=512, tk=512,
                       compute_dtype=jnp.bfloat16):
    """x: [..., K]; w_t: [K, N] (= linear.weight.T); bias: [N]; A: [K, r]; B: [r, N]."""
    orig_shape = x.shape
    K = orig_shape[-1]
    M = math.prod(orig_shape[:-1])
    N = w_t.shape[1]
    r = A.shape[1]
    assert w_t.shape[0] == K and A.shape[0] == K and B.shape == (r, N)
    assert bias.shape == (N,)

    out_dtype = x.dtype
    cdt = jnp.dtype(compute_dtype)

    x2d = x.reshape(M, K)
    # Hoist the LoRA down-projection out of the kernel: xa depends only on (M, K),
    # so recomputing it for every N tile inside the kernel would waste MXU passes.
    xa2d = jnp.dot(x2d, A, preferred_element_type=jnp.float32)
    # Fold alpha into B so the kernel epilogue needs no extra (tm, tn) VPU multiply.
    b_scaled = B * jnp.asarray(alpha, dtype=B.dtype)

    # Aligned tiles (sublane=8 for M, lane=128 for N/K), padded so tiles divide.
    tm = _tile_for(M, tm, 8)
    tn = _tile_for(N, tn, 128)
    tk = _tile_for(K, tk, 128)
    Mp, Np, Kp = _round_up(M, tm), _round_up(N, tn), _round_up(K, tk)

    x_p = jnp.pad(x2d, ((0, Mp - M), (0, Kp - K))).astype(cdt)
    w_p = jnp.pad(w_t, ((0, Kp - K), (0, Np - N))).astype(cdt)
    xa_p = jnp.pad(xa2d, ((0, Mp - M), (0, 0))).astype(cdt)
    b_p = jnp.pad(b_scaled, ((0, 0), (0, Np - N))).astype(cdt)
    bias_p = jnp.pad(bias.reshape(1, N), ((0, 0), (0, Np - N))).astype(jnp.float32)

    # f32 outputs: accumulate directly into the resident output block (saves a
    # (tm, tn) f32 scratch + epilogue copy).  Narrower outputs keep an f32 scratch.
    accumulate_in_output = jnp.dtype(out_dtype) == jnp.dtype(jnp.float32)
    scratch_shapes = ([] if accumulate_in_output
                      else [pltpu.VMEM((tm, tn), jnp.float32)])

    kernel = functools.partial(_lora_linear_kernel,
                               accumulate_in_output=accumulate_in_output)

    cost = pl.CostEstimate(
        flops=2 * M * N * K + 2 * M * r * N,
        transcendentals=0,
        bytes_accessed=((x_p.size + w_p.size + xa_p.size + b_p.size) * cdt.itemsize
                        + bias_p.size * 4
                        + Mp * Np * jnp.dtype(out_dtype).itemsize),
    )

    grid = (Mp // tm, Np // tn, Kp // tk)

    out_p = pl.pallas_call(
        kernel,
        out_shape=jax.ShapeDtypeStruct((Mp, Np), out_dtype),
        grid_spec=pltpu.PrefetchScalarGridSpec(
            num_scalar_prefetch=0,
            grid=grid,
            in_specs=[
                pl.BlockSpec((tm, tk), lambda i, j, k: (i, k)),   # x
                pl.BlockSpec((tk, tn), lambda i, j, k: (k, j)),   # W^T
                pl.BlockSpec((tm, r), lambda i, j, k: (i, 0)),    # x @ A (precomputed)
                pl.BlockSpec((r, tn), lambda i, j, k: (0, j)),    # alpha * B
                pl.BlockSpec((1, tn), lambda i, j, k: (0, j)),    # bias
            ],
            out_specs=pl.BlockSpec((tm, tn), lambda i, j, k: (i, j)),
            scratch_shapes=scratch_shapes,
        ),
        compiler_params=pltpu.CompilerParams(
            dimension_semantics=("parallel", "parallel", "arbitrary")),
        cost_estimate=cost,
    )(x_p, w_p, xa_p, b_p, bias_p)

    out2d = out_p[:M, :N]
    return out2d.reshape(*orig_shape[:-1], N)


class LoRALinearPallas:
    """Deterministic (eval-mode) re-implementation of the PyTorch LoRALinear forward."""

    def __init__(self, w_t, bias, A, B, alpha, compute_dtype=jnp.bfloat16):
        self.w_t = w_t        # [in_features, out_features]  (torch weight transposed)
        self.bias = bias      # [out_features]
        self.A = A            # [in_features, rank]
        self.B = B            # [rank, out_features]
        self.alpha = alpha
        self.compute_dtype = compute_dtype

    def __call__(self, x):
        return lora_linear_pallas(x, self.w_t, self.bias, self.A, self.B,
                                  self.alpha, compute_dtype=self.compute_dtype)


def _lora_linear_reference(x, w_t, bias, A, B, alpha):
    """Pure-JAX mirror of the PyTorch forward (eval-mode dropout)."""
    x1 = x @ w_t + bias
    x2 = alpha * ((x @ A) @ B)
    return x1 + x2


if __name__ == "__main__":
    batch, seq, in_features, out_features, rank = 2, 8, 32, 32, 4
    alpha = 2.0

    key = jax.random.PRNGKey(0)
    k1, k2, k3, k4, k5 = jax.random.split(key, 5)

    x = jax.random.normal(k1, (batch, seq, in_features), dtype=jnp.float32)
    # torch nn.Linear weight is [out, in]; the kernel consumes its transpose.
    w = jax.random.normal(k2, (out_features, in_features), dtype=jnp.float32) * 0.1
    bias = jax.random.normal(k3, (out_features,), dtype=jnp.float32) * 0.1
    A = jax.random.normal(k4, (in_features, rank), dtype=jnp.float32) / jnp.sqrt(rank)
    # torch init has B == 0 (LoRA branch inert); use a nonzero B here so the
    # low-rank path is actually exercised by the correctness check.
    B = jax.random.normal(k5, (rank, out_features), dtype=jnp.float32) * 0.1

    ref = _lora_linear_reference(x, w.T, bias, A, B, alpha)

    # Exact-path check (f32 on the MXU) with tight tolerance.
    out_f32 = lora_linear_pallas(x, w.T, bias, A, B, alpha,
                                 compute_dtype=jnp.float32)
    out_f32 = jax.block_until_ready(out_f32)
    assert out_f32.shape == ref.shape and out_f32.dtype == x.dtype
    assert jnp.allclose(out_f32, ref, atol=1e-3, rtol=1e-3), "f32 path mismatch"

    # Default fast path: bf16 MXU inputs, f32 accumulation -> looser tolerance.
    mod = LoRALinearPallas(w.T, bias, A, B, alpha)
    out_bf16 = jax.block_until_ready(mod(x))
    assert out_bf16.shape == ref.shape and out_bf16.dtype == x.dtype
    assert jnp.allclose(out_bf16, ref, atol=3e-2, rtol=3e-2), "bf16 path mismatch"

    print("KERNEL_OK")
</pallas_src>

<mosaic_0001>
module attributes {stable_mosaic.version = 11 : i64} {
  func.func @_lora_linear_kernel(%arg0: i32, %arg1: i32, %arg2: i32, %arg3: memref<16x128xf32, #tpu.memory_space<vmem>>, %arg4: memref<128x128xf32, #tpu.memory_space<vmem>>, %arg5: memref<16x4xf32, #tpu.memory_space<vmem>>, %arg6: memref<4x128xf32, #tpu.memory_space<vmem>>, %arg7: memref<1x128xf32, #tpu.memory_space<vmem>>, %arg8: memref<16x128xf32, #tpu.memory_space<vmem>>) attributes {dimension_semantics = [#tpu.dimension_semantics<parallel>, #tpu.dimension_semantics<parallel>, #tpu.dimension_semantics<arbitrary>], iteration_bounds = array<i64: 1, 1, 1>, scalar_prefetch = 0 : i64, scratch_operands = 0 : i64, tpu.core_type = #tpu.core_type<tc>, window_params = [{transform_indices = @transform_0, window_bounds = array<i64: 16, 128>}, {transform_indices = @transform_1, window_bounds = array<i64: 128, 128>}, {transform_indices = @transform_2, window_bounds = array<i64: 16, 4>}, {transform_indices = @transform_3, window_bounds = array<i64: 4, 128>}, {transform_indices = @transform_4, window_bounds = array<i64: 1, 128>}, {transform_indices = @transform_5, window_bounds = array<i64: 16, 128>}]} {
    %c0_i32 = arith.constant 0 : i32
    %0 = arith.cmpi eq, %arg2, %c0_i32 : i32
    %1 = arith.extui %0 : i1 to i32
    %c0_i32_0 = arith.constant 0 : i32
    %2 = arith.cmpi ne, %1, %c0_i32_0 : i32
    scf.if %2 {
      %cst_10 = arith.constant 0.000000e+00 : f32
      %12 = vector.broadcast %cst_10 : f32 to vector<16x128xf32>
      %c0_11 = arith.constant 0 : index
      %c0_12 = arith.constant 0 : index
      %13 = vector.load %arg8[%c0_11, %c0_12] : memref<16x128xf32, #tpu.memory_space<vmem>>, vector<16x128xf32>
      tpu.vector_store %arg8[%c0_11, %c0_12], %12 {strides = array<i32>} : memref<16x128xf32, #tpu.memory_space<vmem>>, vector<16x128xf32>,
    } else {
    }
    %c0 = arith.constant 0 : index
    %c0_1 = arith.constant 0 : index
    %3 = vector.load %arg8[%c0, %c0_1] : memref<16x128xf32, #tpu.memory_space<vmem>>, vector<16x128xf32>
    %c0_2 = arith.constant 0 : index
    %c0_3 = arith.constant 0 : index
    %4 = vector.load %arg3[%c0_2, %c0_3] : memref<16x128xf32, #tpu.memory_space<vmem>>, vector<16x128xf32>
    %c0_4 = arith.constant 0 : index
    %c0_5 = arith.constant 0 : index
    %5 = vector.load %arg4[%c0_4, %c0_5] : memref<128x128xf32, #tpu.memory_space<vmem>>, vector<128x128xf32>
    %cst = arith.constant dense<0.000000e+00> : vector<16x128xf32>
    %6 = tpu.matmul %4, %5, %cst {dimension_numbers = #tpu.dot_dimension_numbers<[1], [0], [0], [1], [0, 0, 1, 1], [], []>} : vector<16x128xf32>, vector<128x128xf32>, vector<16x128xf32> -> vector<16x128xf32>
    %7 = arith.addf %3, %6 : vector<16x128xf32>
    %c0_6 = arith.constant 0 : index
    %c0_7 = arith.constant 0 : index
    %8 = vector.load %arg8[%c0_6, %c0_7] : memref<16x128xf32, #tpu.memory_space<vmem>>, vector<16x128xf32>
    tpu.vector_store %arg8[%c0_6, %c0_7], %7 {strides = array<i32>} : memref<16x128xf32, #tpu.memory_space<vmem>>, vector<16x128xf32>,
    %c0_i32_8 = arith.constant 0 : i32
    %9 = arith.cmpi eq, %arg2, %c0_i32_8 : i32
    %10 = arith.extui %9 : i1 to i32
    %c0_i32_9 = arith.constant 0 : i32
    %11 = arith.cmpi ne, %10, %c0_i32_9 : i32
    scf.if %11 {
      %c0_10 = arith.constant 0 : index
      %c0_11 = arith.constant 0 : index
      %12 = vector.load %arg5[%c0_10, %c0_11] : memref<16x4xf32, #tpu.memory_space<vmem>>, vector<16x4xf32>
      %c0_12 = arith.constant 0 : index
      %c0_13 = arith.constant 0 : index
      %13 = vector.load %arg6[%c0_12, %c0_13] : memref<4x128xf32, #tpu.memory_space<vmem>>, vector<4x128xf32>
      %cst_14 = arith.constant dense<0.000000e+00> : vector<16x128xf32>
      %14 = tpu.matmul %12, %13, %cst_14 {dimension_numbers = #tpu.dot_dimension_numbers<[1], [0], [0], [1], [0, 0, 1, 1], [], []>} : vector<16x4xf32>, vector<4x128xf32>, vector<16x128xf32> -> vector<16x128xf32>
      %c0_15 = arith.constant 0 : index
      %c0_16 = arith.constant 0 : index
      %15 = vector.load %arg8[%c0_15, %c0_16] : memref<16x128xf32, #tpu.memory_space<vmem>>, vector<16x128xf32>
      %c0_17 = arith.constant 0 : index
      %c0_18 = arith.constant 0 : index
      %16 = vector.load %arg7[%c0_17, %c0_18] : memref<1x128xf32, #tpu.memory_space<vmem>>, vector<1x128xf32>
      %17 = vector.broadcast %16 : vector<1x128xf32> to vector<16x128xf32>
      %18 = arith.addf %15, %17 : vector<16x128xf32>
      %19 = arith.addf %18, %14 : vector<16x128xf32>
      %c0_19 = arith.constant 0 : index
      %c0_20 = arith.constant 0 : index
      %20 = vector.load %arg8[%c0_19, %c0_20] : memref<16x128xf32, #tpu.memory_space<vmem>>, vector<16x128xf32>
      tpu.vector_store %arg8[%c0_19, %c0_20], %19 {strides = array<i32>} : memref<16x128xf32, #tpu.memory_space<vmem>>, vector<16x128xf32>,
    } else {
    }
    return
  }
  func.func @transform_0(%arg0: i32, %arg1: i32, %arg2: i32) -> (i32, i32) {
    %c0_i32 = arith.constant 0 : i32
    return %arg0, %arg2 : i32, i32
  }
  func.func @transform_1(%arg0: i32, %arg1: i32, %arg2: i32) -> (i32, i32) {
    %c0_i32 = arith.constant 0 : i32
    return %arg2, %arg1 : i32, i32
  }
  func.func @transform_2(%arg0: i32, %arg1: i32, %arg2: i32) -> (i32, i32) {
    %c0_i32 = arith.constant 0 : i32
    %c0_i32_0 = arith.constant 0 : i32
    return %arg0, %c0_i32 : i32, i32
  }
  func.func @transform_3(%arg0: i32, %arg1: i32, %arg2: i32) -> (i32, i32) {
    %c0_i32 = arith.constant 0 : i32
    %c0_i32_0 = arith.constant 0 : i32
    return %c0_i32, %arg1 : i32, i32
  }
  func.func @transform_4(%arg0: i32, %arg1: i32, %arg2: i32) -> (i32, i32) {
    %c0_i32 = arith.constant 0 : i32
    %c0_i32_0 = arith.constant 0 : i32
    return %c0_i32, %arg1 : i32, i32
  }
  func.func @transform_5(%arg0: i32, %arg1: i32, %arg2: i32) -> (i32, i32) {
    %c0_i32 = arith.constant 0 : i32
    return %arg0, %arg1 : i32, i32
  }
}

</mosaic_0001>

<bundles_post_ra>
// kernel: tpu_custom_call.1
= control target key start
LH: loop header
LB: loop body
LE: loop exit
PB: predicated region body
PF: predicated region fallthrough
CT: control target
= control target key end

     0   :  { %10 = vsyncpa [#allocation3], 0  ;;  %s442_s0 = inlined_call_operand.vmem [shape: f32[16,128], index: 0, kind: input, shape index: {}]   ;;  %s443_s1 = inlined_call_operand.hbm [shape: f32[128,128], index: 1, kind: input, shape index: {}]   ;;  %s444_s2 = inlined_call_operand.vmem [shape: f32[16,4], index: 2, kind: input, shape index: {}]   ;;  %s445_s3 = inlined_call_operand.vmem [shape: f32[4,128], index: 3, kind: input, shape index: {}]   ;;  %s446_s4 = inlined_call_operand.vmem [shape: f32[1,128], index: 4, kind: input, shape index: {}]   ;;  %s447_s5 = inlined_call_operand.hbm [shape: f32[16,128], index: 5, kind: output, shape index: {}]  }
   0x1   :  { %11 = vsyncpa [#allocation4], 0  ;;  %s378_s18 = smov [#allocation2]  }
   0x2   :  { %s19_s19 = sshll.u32 %s378_s18, 4  ;;  %s20_s19 = int_to_ptr.vmem [resolvable:$true] %s19_s19 }
   0x3   :  { %s342_s20 = scalar_lea.vmem %s20_s19, 2048  ;;  %p347_p1 = scmp.lt.s32.totalorder %s20_s19, %s20_s19 }
   0x4   :  { %p343_p0 = scmp.ne.s32.totalorder %s20_s19, %s342_s20  ;;  %p348_p2 = scmp.lt.s32.totalorder %s342_s20, %s342_s20 }
   0x6   :  { %p349_p3 = por %p348_p2, %p347_p1 }
   0x8   :  { %p350_p4 = pnand %p349_p3, %p343_p0 }
   0xa   :  { %353 = shalt.err (!%p350_p4)
}
   0xb   :  { %s379_s21 = smov 128   ;;  %s380_s22 = smov 8  }
   0xc   :  { %25 = dma.hbm_to_vmem [thread:$0]  %s443_s1, 2048, %s20_s19, [#allocation3], %s379_s21, %s379_s21, %s380_s22  }
   0xd   :  { %374 = dma.done.wait [#allocation3], 2048  }
   0xe   :  { %375 = vsyncadd [#allocation3], 4294965248  ;;  %v60_v0 = vld [vmem:[#allocation2 + $0x78] sm:$0xff]  ;;  %v59_v1 = vld [vmem:[#allocation2 + $0x70] sm:$0xff]  ;;  %vm153_vm0 = vcmask 1043456   ;;  %vm146_vm1 = vcmask 31744  }
   0xf   :  { %289 = vmatprep.subr.mxu0 %v60_v0  ;;  %v58_v2 = vld [vmem:[#allocation2 + $0x68] sm:$0xff]  ;;  %v57_v3 = vld [vmem:[#allocation2 + $0x60] sm:$0xff]  ;;  %v56_v5 = vld [vmem:[#allocation2 + $0x58] sm:$0xff]  ;;  %s381_s9 = smov [#allocation5]  }
  0x10   :  { %290 = vmatpush3.msra.mxu0 %v60_v0  ;;  %v43_v4 = vld [vmem:[%s442_s0] sm:$0xff]  ;;  %v144_v8 = vld [vmem:[%s444_s2 + $0x8] sm:$0xff]  ;;  %v55_v9 = vld [vmem:[#allocation2 + $0x50] sm:$0xff]  ;;  %s252_s10 = sshll.u32 %s381_s9, 4  ;;  %s253_s10 = int_to_ptr.vmem [resolvable:$true] %s252_s10 }
  0x11   :  { %291 = vmatprep.subr.mxu0 %v59_v1  ;;  %321 = vmatprep.mubr.f32.mxu0 %v43_v4  ;;  %v145_v6 = vld [vmem:[%s445_s3] sm:$0xf]  ;;  %v54_v10 = vld [vmem:[#allocation2 + $0x48] sm:$0xff]  ;;  %v52_v12 = vld [vmem:[#allocation2 + $0x38] sm:$0xff]  ;;  %p359_p6 = scmp.lt.s32.totalorder %s253_s10, %s253_s10 }
  0x12   :  { %292 = vmatpush3.msra.mxu0 %v59_v1  ;;  %v143_v7 = vld [vmem:[%s444_s2] sm:$0xff]  ;;  %324 = vmatprep.subr.msk.mxu1 %vm153_vm0, %v145_v6  ;;  %v51_v13 = vld [vmem:[#allocation2 + $0x30] sm:$0xff]  ;;  %v50_v14 = vld [vmem:[#allocation2 + $0x28] sm:$0xff] }
  0x13   :  { %293 = vmatprep.subr.mxu0 %v58_v2  ;;  %325 = vmatpush3.msk.msra.mxu1 %vm153_vm0, %v145_v6  ;;  %v53_v11 = vld [vmem:[#allocation2 + $0x40] sm:$0xff]  ;;  %v48_v16 = vld [vmem:[#allocation2 + $0x18] sm:$0xff]  ;;  %v47_v17 = vld [vmem:[#allocation2 + $0x10] sm:$0xff] }
  0x14   :  { %294 = vmatpush3.msra.mxu0 %v58_v2  ;;  %326 = vmatprep.mubr.msk.f32.mxu1 %vm146_vm1, %v143_v7  ;;  %v49_v15 = vld [vmem:[#allocation2 + $0x20] sm:$0xff]  ;;  %v46_v18 = vld [vmem:[#allocation2 + $0x8] sm:$0xff] }
  0x15   :  { %295 = vmatprep.subr.mxu0 %v57_v3  ;;  %327 = vmatmul.mubr.msk.f32.vlgmr.msra.gmra.mxu1 %vm146_vm1, %v144_v8  ;;  %v45_v19 = vld [vmem:[#allocation2] sm:$0xff]  ;;  %v44_v20 = vld [vmem:[%s442_s0 + $0x8] sm:$0xff]  ;;  %s354_s0 = scalar_lea.vmem %s253_s10, 256 }
  0x16   :  { %296 = vmatpush3.msra.mxu0 %v57_v3  ;;  %v267_v22 = vld [vmem:[%s446_s4] ss:$0 sm:$0xff]  ;;  %p355_p5 = scmp.ne.s32.totalorder %s253_s10, %s354_s0  ;;  %p360_p7 = scmp.lt.s32.totalorder %s354_s0, %s354_s0 }
  0x17   :  { %297 = vmatprep.subr.mxu0 %v56_v5 }
  0x18   :  { %298 = vmatpush3.msra.mxu0 %v56_v5  ;;  %p361_p8 = por %p360_p7, %p359_p6 }
  0x19   :  { %299 = vmatprep.subr.mxu0 %v55_v9 }
  0x1a   :  { %300 = vmatpush3.msra.mxu0 %v55_v9  ;;  %p362_p9 = pnand %p361_p8, %p355_p5 }
  0x1b   :  { %301 = vmatprep.subr.mxu0 %v54_v10 }
  0x1c   :  { %302 = vmatpush3.msra.mxu0 %v54_v10 }
  0x1d   :  { %303 = vmatprep.subr.mxu0 %v53_v11 }
  0x1e   :  { %304 = vmatpush3.msra.mxu0 %v53_v11 }
  0x1f   :  { %305 = vmatprep.subr.mxu0 %v52_v12 }
  0x20   :  { %306 = vmatpush3.msra.mxu0 %v52_v12 }
  0x21   :  { %307 = vmatprep.subr.mxu0 %v51_v13 }
  0x22   :  { %308 = vmatpush3.msra.mxu0 %v51_v13 }
  0x23   :  { %309 = vmatprep.subr.mxu0 %v50_v14 }
  0x24   :  { %310 = vmatpush3.msra.mxu0 %v50_v14 }
  0x25   :  { %311 = vmatprep.subr.mxu0 %v49_v15 }
  0x26   :  { %312 = vmatpush3.msra.mxu0 %v49_v15 }
  0x27   :  { %313 = vmatprep.subr.mxu0 %v48_v16 }
  0x28   :  { %314 = vmatpush3.msra.mxu0 %v48_v16 }
  0x29   :  { %315 = vmatprep.subr.mxu0 %v47_v17 }
  0x2a   :  { %316 = vmatpush3.msra.mxu0 %v47_v17 }
  0x2b   :  { %317 = vmatprep.subr.mxu0 %v46_v18 }
  0x2c   :  { %318 = vmatpush3.msra.mxu0 %v46_v18 }
  0x2d   :  { %319 = vmatprep.subr.mxu0 %v45_v19 }
  0x2e   :  { %320 = vmatpush3.msra.mxu0 %v45_v19 }
  0x2f   :  { %322 = vmatmul.mubr.f32.vlgmr.msra.gmra.mxu0 %v44_v20 }
  0xd5   :  { %v328_v24 = vpop.f32.mrf.mxu1 }
  0xd7   :  { %v223_v28 = vpop.f32.mrf.mxu1 }
  0xef   :  { %v323_v21 = vpop.f32.mrf.mxu0 }
  0xf0   :  { %v242_v25 = vadd.f32 %v323_v21, %v267_v22 }
  0xf1   :  { %v127_v23 = vpop.f32.mrf.mxu0 }
  0xf2   :  { %v244_v26 = vadd.f32 %v328_v24, %v242_v25  ;;  %v241_v27 = vadd.f32 %v267_v22, %v127_v23 }
  0xf4   :  { %246 = vst [vmem:[#allocation5 + $0x8] sm:$0xff] %v244_v26  ;;  %v243_v29 = vadd.f32 %v241_v27, %v223_v28 }
  0xf6   :  { %245 = vst [vmem:[#allocation5] sm:$0xff] %v243_v29 }
  0xf7   :  { %365 = shalt.err (!%p362_p9)
}
  0xf8   :  { %258 = dma.vmem_to_hbm [thread:$0]  %s253_s10, 256, %s447_s5, [#allocation4], %s379_s21, %s379_s21, %s380_s22  }
  0xf9   :  { %376 = dma.done.wait [#allocation4], 256  }
  0xfa   :  { %377 = vsyncadd [#allocation4], 4294967040 }
  0xfb   :  { %262 = vsyncpa [#allocation3], 1 }
  0xfc   :  { %263 = vsyncpa [#allocation4], 1 }

</bundles_post_ra>
